<compile_context>
chip_gen: v5e
topology: v5e:2x2
jax: 0.10.0
libtpu: 0.0.40
codegen_flags: <defaults>
</compile_context>

<pallas_src>
import numpy as np
import jax
import jax.numpy as jnp
from jax import lax
from jax.experimental import pallas as pl
from jax.experimental.pallas import tpu as pltpu


def _pick_tile(dim, target, align):
    """Largest tile <= target that is a multiple of `align` and divides `dim`.
    Falls back to the full dim (always a legal block shape)."""
    if dim <= target:
        return dim
    t = (target // align) * align
    while t >= align:
        if dim % t == 0:
            return t
        t -= align
    return dim


# ----------------------------------------------------------------------------
# Kernel 1: tiled dense projection  y = x @ W^T + b   (PyTorch nn.Linear semantics)
# ----------------------------------------------------------------------------
def _linear_kernel(x_ref, w_ref, b_ref, o_ref):
    # Contract the last dim of both operands (trans_b form) -- the MXU consumes
    # this natively, so no XLU transpose / VMEM relayout of the weight tile.
    y = lax.dot_general(
        x_ref[...], w_ref[...],
        dimension_numbers=(((1,), (1,)), ((), ())),
        preferred_element_type=jnp.float32,
    )
    o_ref[...] = y + b_ref[...]


def linear(x, w, b, *, tm_target=512, tn_target=512):
    """x: (M, Din), w: (Dout, Din) [PyTorch layout], b: (Dout,) -> (M, Dout) float32."""
    M, Din = x.shape
    Dout = w.shape[0]
    tm = _pick_tile(M, tm_target, 8)        # sublane-aligned row tile
    tn = _pick_tile(Dout, tn_target, 128)   # lane-aligned output-feature tile
    grid = (M // tm, Dout // tn)
    return pl.pallas_call(
        _linear_kernel,
        out_shape=jax.ShapeDtypeStruct((M, Dout), jnp.float32),
        grid=grid,
        in_specs=[
            pl.BlockSpec((tm, Din), lambda i, j: (i, 0)),
            pl.BlockSpec((tn, Din), lambda i, j: (j, 0)),
            pl.BlockSpec((1, tn), lambda i, j: (0, j)),
        ],
        out_specs=pl.BlockSpec((tm, tn), lambda i, j: (i, j)),
        compiler_params=pltpu.CompilerParams(
            dimension_semantics=("parallel", "parallel")),
    )(x, w, b.reshape(1, Dout))


# ----------------------------------------------------------------------------
# Kernel 2: scaled dot-product attention, one grid step per batch, all heads per step.
#   scores = Q K^T / sqrt(d_k); masked_fill(mask, -10000); softmax; ctx = attn V
# ----------------------------------------------------------------------------
def _make_attn_kernel(d_k, num_heads):
    inv_sqrt_dk = 1.0 / float(np.sqrt(d_k))
    H = num_heads

    def attn_kernel(q_ref, k_ref, v_ref, m_ref, ctx_ref, attn_ref):
        q = q_ref[0] * inv_sqrt_dk         # (H, Lq, d_k), pre-scaled queries
        k = k_ref[0]                       # (H, Lk, d_k)
        v = v_ref[0]                       # (H, Lk, d_v)
        m = m_ref[0]                       # (Lq, Lk) int32, 1 = masked

        # All heads in one batched MXU call; contraction over d_k (no explicit k.T).
        s = jnp.einsum("hqd,hkd->hqk", q, k,
                       preferred_element_type=jnp.float32)
        s = jnp.where(m[None, :, :] != 0, jnp.float32(-10000.0), s)

        smax = jnp.max(s, axis=-1, keepdims=True)
        e = jnp.exp(s - smax)
        denom = jnp.sum(e, axis=-1, keepdims=True)
        attn = e / denom                   # exact normalization (no approx reciprocal)
        attn_ref[0] = attn

        ctx = jnp.einsum("hqk,hkd->hqd", attn, v,
                         preferred_element_type=jnp.float32)   # (H, Lq, d_v)
        # Lane-dense (Lq, H*d_v) output slab, head-major in the last dim
        # (matches PyTorch's transpose(1,2).reshape(N, -1, H*d_v)).
        ctx_ref[0] = jnp.concatenate([ctx[h] for h in range(H)], axis=-1)

    return attn_kernel


def scaled_dot_attention(Qh, Kh, Vh, mask, d_k):
    """Qh: (N,H,Lq,d_k), Kh/Vh: (N,H,Lk,d), mask: (N,Lq,Lk) int32 (1 = masked).
    Returns ctx (N, Lq, H*d_v) and attn (N, H, Lq, Lk)."""
    N, H, Lq, dk = Qh.shape
    Lk = Kh.shape[2]
    dv = Vh.shape[3]
    ctx, attn = pl.pallas_call(
        _make_attn_kernel(d_k, H),
        out_shape=(
            jax.ShapeDtypeStruct((N, Lq, H * dv), jnp.float32),
            jax.ShapeDtypeStruct((N, H, Lq, Lk), jnp.float32),
        ),
        grid=(N,),
        in_specs=[
            pl.BlockSpec((1, H, Lq, dk), lambda b: (b, 0, 0, 0)),
            pl.BlockSpec((1, H, Lk, dk), lambda b: (b, 0, 0, 0)),
            pl.BlockSpec((1, H, Lk, dv), lambda b: (b, 0, 0, 0)),
            # mask is NOT head-replicated; every head in the step reuses this block
            pl.BlockSpec((1, Lq, Lk), lambda b: (b, 0, 0)),
        ],
        out_specs=(
            pl.BlockSpec((1, Lq, H * dv), lambda b: (b, 0, 0)),
            pl.BlockSpec((1, H, Lq, Lk), lambda b: (b, 0, 0, 0)),
        ),
        compiler_params=pltpu.CompilerParams(dimension_semantics=("parallel",)),
    )(Qh, Kh, Vh, mask)
    return ctx, attn


# ----------------------------------------------------------------------------
# MultiHeadAttention forward (parameter glue in plain JAX, hot paths in Pallas)
# ----------------------------------------------------------------------------
def init_params(key, d_k, d_v, d_model, num_heads):
    ks = jax.random.split(key, 8)
    std_qk = np.sqrt(2.0 / (d_model + d_k))
    std_v = np.sqrt(2.0 / (d_model + d_v))
    dk_h, dv_h = d_k * num_heads, d_v * num_heads
    # weights: PyTorch Linear layout (out_features, in_features)
    return {
        "W_Q": jax.random.normal(ks[0], (dk_h, d_model), jnp.float32) * std_qk,
        "b_Q": jax.random.uniform(ks[1], (dk_h,), jnp.float32, -0.1, 0.1),
        "W_K": jax.random.normal(ks[2], (dk_h, d_model), jnp.float32) * std_qk,
        "b_K": jax.random.uniform(ks[3], (dk_h,), jnp.float32, -0.1, 0.1),
        "W_V": jax.random.normal(ks[4], (dv_h, d_model), jnp.float32) * std_v,
        "b_V": jax.random.uniform(ks[5], (dv_h,), jnp.float32, -0.1, 0.1),
        "W_out": jax.random.normal(ks[6], (d_model, dv_h), jnp.float32) * std_v,
        "b_out": jax.random.uniform(ks[7], (d_model,), jnp.float32, -0.1, 0.1),
    }


def multi_head_attention(params, Q, K, V, attn_mask, d_k, d_v, num_heads):
    N, Lq, d_model = Q.shape
    Lk = K.shape[1]
    H = num_heads

    if Q is K and K is V:
        # Self-attention: ONE fused QKV projection -> input activations read once,
        # two fewer kernel launches.
        W_qkv = jnp.concatenate([params["W_Q"], params["W_K"], params["W_V"]], axis=0)
        b_qkv = jnp.concatenate([params["b_Q"], params["b_K"], params["b_V"]], axis=0)
        qkv = linear(Q.reshape(N * Lq, d_model), W_qkv, b_qkv)
        q = qkv[:, : H * d_k]
        k = qkv[:, H * d_k: 2 * H * d_k]
        v = qkv[:, 2 * H * d_k:]
    else:
        q = linear(Q.reshape(N * Lq, d_model), params["W_Q"], params["b_Q"])
        k = linear(K.reshape(N * Lk, d_model), params["W_K"], params["b_K"])
        v = linear(V.reshape(N * Lk, d_model), params["W_V"], params["b_V"])

    # (N, L, H, d) -> (N, H, L, d) head split (plain XLA, single pass)
    Qh = q.reshape(N, Lq, H, d_k).transpose(0, 2, 1, 3)
    Kh = k.reshape(N, Lk, H, d_k).transpose(0, 2, 1, 3)
    Vh = v.reshape(N, Lk, H, d_v).transpose(0, 2, 1, 3)

    if attn_mask is None:
        mask = jnp.zeros((N, Lq, Lk), jnp.int32)
    else:
        mask = attn_mask.astype(jnp.int32)     # un-broadcast: (N, Lq, Lk), 1 = masked

    ctx, attn = scaled_dot_attention(Qh, Kh, Vh, mask, d_k)

    # ctx is already lane-dense (N, Lq, H*d_v): no transpose before the output proj.
    out = linear(ctx.reshape(N * Lq, H * d_v), params["W_out"], params["b_out"])
    return out.reshape(N, Lq, d_model), attn


# ----------------------------------------------------------------------------
# Pure-JAX reference (mirrors the PyTorch forward) for correctness checking.
# Run at HIGHEST matmul precision so it is true f32 (the default on TPU routes
# f32 matmuls through low-precision bf16 MXU passes).
# ----------------------------------------------------------------------------
def reference_mha(params, Q, K, V, attn_mask, d_k, d_v, num_heads):
    hp = lax.Precision.HIGHEST
    N, Lq, d_model = Q.shape
    Lk = K.shape[1]
    q = jnp.matmul(Q, params["W_Q"].T, precision=hp) + params["b_Q"]
    k = jnp.matmul(K, params["W_K"].T, precision=hp) + params["b_K"]
    v = jnp.matmul(V, params["W_V"].T, precision=hp) + params["b_V"]
    Qs = q.reshape(N, Lq, num_heads, d_k).transpose(0, 2, 1, 3)
    Ks = k.reshape(N, Lk, num_heads, d_k).transpose(0, 2, 1, 3)
    Vs = v.reshape(N, Lk, num_heads, d_v).transpose(0, 2, 1, 3)
    scores = jnp.einsum("nhqd,nhkd->nhqk", Qs, Ks, precision=hp) / np.sqrt(d_k)
    if attn_mask is not None:
        m = jnp.broadcast_to(attn_mask[:, None].astype(bool), scores.shape)
        scores = jnp.where(m, -10000.0, scores)
    attn = jax.nn.softmax(scores, axis=-1)
    ctx = jnp.einsum("nhqk,nhkd->nhqd", attn, Vs, precision=hp)
    ctx = ctx.transpose(0, 2, 1, 3).reshape(N, Lq, num_heads * d_v)
    out = jnp.matmul(ctx, params["W_out"].T, precision=hp) + params["b_out"]
    return out, attn


if __name__ == "__main__":
    # Small shapes consistent with the module: d_model = num_heads * d_k
    N, L = 2, 8
    num_heads, d_k, d_v = 4, 8, 8
    d_model = num_heads * d_k  # 32

    key = jax.random.PRNGKey(0)
    kp, kx, km, kq2, kk2, kv2 = jax.random.split(key, 6)

    params = init_params(kp, d_k, d_v, d_model, num_heads)

    # Tolerance: absorbs the TPU MXU's default f32-matmul behaviour (bf16 passes,
    # ~0.4% relative per matmul) while still catching any logic/layout error (O(1)).
    ATOL = RTOL = 2e-2

    # --- self-attention path (fused QKV projection) with a padding-style mask ---
    x = jax.random.normal(kx, (N, L, d_model), jnp.float32)
    attn_mask = jax.random.bernoulli(km, 0.2, (N, L, L))   # True = masked

    out, attn = multi_head_attention(params, x, x, x, attn_mask, d_k, d_v, num_heads)
    out, attn = jax.block_until_ready(out), jax.block_until_ready(attn)
    ref_out, ref_attn = reference_mha(params, x, x, x, attn_mask, d_k, d_v, num_heads)
    assert np.allclose(np.asarray(out), np.asarray(ref_out), atol=ATOL, rtol=RTOL), \
        float(np.max(np.abs(np.asarray(out) - np.asarray(ref_out))))
    assert np.allclose(np.asarray(attn), np.asarray(ref_attn), atol=ATOL, rtol=RTOL), \
        float(np.max(np.abs(np.asarray(attn) - np.asarray(ref_attn))))

    # --- cross-attention path (separate Q/K/V, different key length, no mask) ---
    Lk = 16
    Q2 = jax.random.normal(kq2, (N, L, d_model), jnp.float32)
    K2 = jax.random.normal(kk2, (N, Lk, d_model), jnp.float32)
    V2 = jax.random.normal(kv2, (N, Lk, d_model), jnp.float32)
    out2, attn2 = multi_head_attention(params, Q2, K2, V2, None, d_k, d_v, num_heads)
    out2, attn2 = jax.block_until_ready(out2), jax.block_until_ready(attn2)
    ref_out2, ref_attn2 = reference_mha(params, Q2, K2, V2, None, d_k, d_v, num_heads)
    assert np.allclose(np.asarray(out2), np.asarray(ref_out2), atol=ATOL, rtol=RTOL), \
        float(np.max(np.abs(np.asarray(out2) - np.asarray(ref_out2))))
    assert np.allclose(np.asarray(attn2), np.asarray(ref_attn2), atol=ATOL, rtol=RTOL), \
        float(np.max(np.abs(np.asarray(attn2) - np.asarray(ref_attn2))))

    print("KERNEL_OK")
</pallas_src>

<mosaic_0001>
module attributes {stable_mosaic.version = 11 : i64} {
  func.func @_linear_kernel(%arg0: i32, %arg1: i32, %arg2: memref<16x32xf32, #tpu.memory_space<vmem>>, %arg3: memref<96x32xf32, #tpu.memory_space<vmem>>, %arg4: memref<1x96xf32, #tpu.memory_space<vmem>>, %arg5: memref<16x96xf32, #tpu.memory_space<vmem>>) attributes {dimension_semantics = [#tpu.dimension_semantics<parallel>, #tpu.dimension_semantics<parallel>], iteration_bounds = array<i64: 1, 1>, scalar_prefetch = 0 : i64, scratch_operands = 0 : i64, tpu.core_type = #tpu.core_type<tc>, window_params = [{transform_indices = @transform_0, window_bounds = array<i64: 16, 32>}, {transform_indices = @transform_1, window_bounds = array<i64: 96, 32>}, {transform_indices = @transform_2, window_bounds = array<i64: 1, 96>}, {transform_indices = @transform_3, window_bounds = array<i64: 16, 96>}]} {
    %c0 = arith.constant 0 : index
    %c0_0 = arith.constant 0 : index
    %0 = vector.load %arg2[%c0, %c0_0] : memref<16x32xf32, #tpu.memory_space<vmem>>, vector<16x32xf32>
    %c0_1 = arith.constant 0 : index
    %c0_2 = arith.constant 0 : index
    %1 = vector.load %arg3[%c0_1, %c0_2] : memref<96x32xf32, #tpu.memory_space<vmem>>, vector<96x32xf32>
    %cst = arith.constant dense<0.000000e+00> : vector<16x96xf32>
    %2 = tpu.matmul %0, %1, %cst {dimension_numbers = #tpu.dot_dimension_numbers<[1], [1], [0], [0], [0, 0, 1, 0], [], []>} : vector<16x32xf32>, vector<96x32xf32>, vector<16x96xf32> -> vector<16x96xf32>
    %c0_3 = arith.constant 0 : index
    %c0_4 = arith.constant 0 : index
    %3 = vector.load %arg4[%c0_3, %c0_4] : memref<1x96xf32, #tpu.memory_space<vmem>>, vector<1x96xf32>
    %4 = vector.broadcast %3 : vector<1x96xf32> to vector<16x96xf32>
    %5 = arith.addf %2, %4 : vector<16x96xf32>
    %c0_5 = arith.constant 0 : index
    %c0_6 = arith.constant 0 : index
    %6 = vector.load %arg5[%c0_5, %c0_6] : memref<16x96xf32, #tpu.memory_space<vmem>>, vector<16x96xf32>
    tpu.vector_store %arg5[%c0_5, %c0_6], %5 {strides = array<i32>} : memref<16x96xf32, #tpu.memory_space<vmem>>, vector<16x96xf32>,
    return
  }
  func.func @transform_0(%arg0: i32, %arg1: i32) -> (i32, i32) {
    %c0_i32 = arith.constant 0 : i32
    %c0_i32_0 = arith.constant 0 : i32
    return %arg0, %c0_i32 : i32, i32
  }
  func.func @transform_1(%arg0: i32, %arg1: i32) -> (i32, i32) {
    %c0_i32 = arith.constant 0 : i32
    %c0_i32_0 = arith.constant 0 : i32
    return %arg1, %c0_i32 : i32, i32
  }
  func.func @transform_2(%arg0: i32, %arg1: i32) -> (i32, i32) {
    %c0_i32 = arith.constant 0 : i32
    %c0_i32_0 = arith.constant 0 : i32
    return %c0_i32, %arg1 : i32, i32
  }
  func.func @transform_3(%arg0: i32, %arg1: i32) -> (i32, i32) {
    %c0_i32 = arith.constant 0 : i32
    return %arg0, %arg1 : i32, i32
  }
}

</mosaic_0001>

<bundles_post_ra>
// kernel: tpu_custom_call.1
= control target key start
LH: loop header
LB: loop body
LE: loop exit
PB: predicated region body
PF: predicated region fallthrough
CT: control target
= control target key end

     0   :  { %vm33_vm0 = vcmask 261120   ;;  %s273_s0 = inlined_call_operand.vmem [shape: f32[16,32], index: 0, kind: input, shape index: {}]   ;;  %s274_s1 = inlined_call_operand.vmem [shape: f32[96,32], index: 1, kind: input, shape index: {}]   ;;  %s275_s2 = inlined_call_operand.vmem [shape: f32[1,96], index: 2, kind: input, shape index: {}]   ;;  %s276_s3 = inlined_call_operand.hbm [shape: f32[16,96], index: 3, kind: output, shape index: {}]  }
   0x1   :  { %v28_v0 = vld [vmem:[%s274_s1 + $0x58] sm:$0xff]  ;;  %v27_v1 = vld [vmem:[%s274_s1 + $0x50] sm:$0xff] }
   0x2   :  { %120 = vmatpush.xpose.msk.msra.mxu0 %vm33_vm0, %v28_v0  ;;  %134 = vmatpush.xpose.msk.msra.mxu1 %vm33_vm0, %v28_v0 }
   0x3   :  { %8 = vsyncpa [#allocation3], 0  ;;  %v26_v2 = vld [vmem:[%s274_s1 + $0x48] sm:$0xff]  ;;  %v25_v3 = vld [vmem:[%s274_s1 + $0x40] sm:$0xff]  ;;  %s108_s18 = sshll.u32 %s276_s3, 4  ;;  %vm99_vm1 = vcmask 785408   ;;  %s109_s18 = int_to_ptr.hbm [resolvable:$true] %s108_s18 }
   0x4   :  { %v24_v4 = vld [vmem:[%s274_s1 + $0x38] sm:$0xff]  ;;  %v23_v5 = vld [vmem:[%s274_s1 + $0x30] sm:$0xff]  ;;  %v22_v6 = vld [vmem:[%s274_s1 + $0x28] sm:$0xff]  ;;  %s178_s19 = smov 8  }
   0x5   :  { %v21_v7 = vld [vmem:[%s274_s1 + $0x20] sm:$0xff]  ;;  %v20_v8 = vld [vmem:[%s274_s1 + $0x18] sm:$0xff]  ;;  %v19_v9 = vld [vmem:[%s274_s1 + $0x10] sm:$0xff] }
   0x6   :  { %121 = vmatpush.xpose.msk.msra.mxu0 %vm33_vm0, %v27_v1  ;;  %135 = vmatpush.xpose.msk.msra.mxu1 %vm33_vm0, %v27_v1  ;;  %v18_v10 = vld [vmem:[%s274_s1 + $0x8] sm:$0xff]  ;;  %v17_v11 = vld [vmem:[%s274_s1] sm:$0xff]  ;;  %s176_s1 = smov [#allocation2]  }
   0x7   :  { %v15_v12 = vld [vmem:[%s273_s0] sm:$0xff]  ;;  %v16_v13 = vld [vmem:[%s273_s0 + $0x8] sm:$0xff]  ;;  %s106_s15 = sshll.u32 %s176_s1, 4  ;;  %s177_s0 = smov 128   ;;  %s107_s15 = int_to_ptr.vmem [resolvable:$true] %s106_s15 }
   0x8   :  { %v149_v14 = vld [vmem:[%s275_s2] ss:$0 sm:$0xff] }
   0xa   :  { %122 = vmatpush.xpose.msk.msra.mxu0 %vm33_vm0, %v26_v2  ;;  %136 = vmatpush.xpose.msk.msra.mxu1 %vm33_vm0, %v26_v2 }
   0xe   :  { %123 = vmatpush.xpose.msk.msra.mxu0 %vm33_vm0, %v25_v3  ;;  %137 = vmatpush.xpose.msk.msra.mxu1 %vm33_vm0, %v25_v3 }
  0x12   :  { %124 = vmatpush.xpose.msk.msra.mxu0 %vm33_vm0, %v24_v4  ;;  %138 = vmatpush.xpose.msk.msra.mxu1 %vm33_vm0, %v24_v4 }
  0x16   :  { %125 = vmatpush.xpose.msk.msra.mxu0 %vm33_vm0, %v23_v5  ;;  %139 = vmatpush.xpose.msk.msra.mxu1 %vm33_vm0, %v23_v5 }
  0x1a   :  { %126 = vmatpush.xpose.msk.msra.mxu0 %vm33_vm0, %v22_v6  ;;  %140 = vmatpush.xpose.msk.msra.mxu1 %vm33_vm0, %v22_v6 }
  0x1e   :  { %127 = vmatpush.xpose.msk.msra.mxu0 %vm33_vm0, %v21_v7  ;;  %141 = vmatpush.xpose.msk.msra.mxu1 %vm33_vm0, %v21_v7 }
  0x22   :  { %128 = vmatpush.xpose.msk.msra.mxu0 %vm33_vm0, %v20_v8  ;;  %142 = vmatpush.xpose.msk.msra.mxu1 %vm33_vm0, %v20_v8 }
  0x26   :  { %129 = vmatpush.xpose.msk.msra.mxu0 %vm33_vm0, %v19_v9  ;;  %143 = vmatpush.xpose.msk.msra.mxu1 %vm33_vm0, %v19_v9 }
  0x2a   :  { %130 = vmatpush.xpose.msk.msra.mxu0 %vm33_vm0, %v18_v10  ;;  %144 = vmatpush.xpose.msk.msra.mxu1 %vm33_vm0, %v18_v10 }
  0x2e   :  { %131 = vmatpush.xpose.msk.msra.mxu0 %vm33_vm0, %v17_v11  ;;  %145 = vmatpush.xpose.msk.msra.mxu1 %vm33_vm0, %v17_v11 }
  0x31   :  { %132 = vmatmul.msk.f32.vlgmr.msra.gmra.mxu0 %vm33_vm0, %v15_v12  ;;  %133 = vmatmul.msk.f32.vlgmr.msra.gmra.mxu1 %vm33_vm0, %v16_v13 }
  0xae   :  { %v93_v15 = vpop.f32.mrf.mxu0  ;;  %v96_v16 = vpop.f32.mrf.mxu1 }
  0xaf   :  { %v94_v17 = vadd.f32 %v149_v14, %v93_v15  ;;  %v97_v18 = vadd.f32 %v149_v14, %v96_v16 }
  0xb1   :  { %100 = vst.msk [vmem:[#allocation2] sm:$0xff] %vm99_vm1, %v94_v17 }
  0xb2   :  { %101 = vst.msk [vmem:[#allocation2 + $0x8] sm:$0xff] %vm99_vm1, %v97_v18 }
  0xb3   :  { %114 = dma.vmem_to_hbm [thread:$0]  %s107_s15, 256, %s109_s18, [#allocation3], %s177_s0, %s177_s0, %s178_s19  }
  0xb4   :  { %174 = dma.done.wait [#allocation3], 256  }
  0xb5   :  { %175 = vsyncadd [#allocation3], 4294967040 }
  0xb6   :  { %119 = vsyncpa [#allocation3], 1 }

</bundles_post_ra>
